<compile_context>
chip_gen: v7x
topology: tpu7x:2x2x1
jax: 0.10.0
libtpu: 0.0.40
codegen_flags: <defaults>
</compile_context>

<pallas_src>
import functools

import jax
import jax.numpy as jnp
import numpy as np
from jax.experimental import pallas as pl
from jax.experimental.pallas import tpu as pltpu


def _addcoords_kernel(coord_ref, xxb_ref, yyb_ref, x_ref, o_ref, *,
                      C, NB, scale_h, scale_w, with_r):
    """One grid step == NB batch elements x one spatial tile.

    coord_ref : (2*N,) f32 in SMEM      per-batch (y_off, x_off), flattened
    xxb_ref   : (sub, TL) f32 in VMEM   row-varying base (precomputed)
    yyb_ref   : (sub, TL) f32 in VMEM   col-varying base (precomputed)
    x_ref     : (NB, C, sub, TL)        pass-through source, native dtype
    o_ref     : (NB, C+n_coord, sub, TL) f32
    """
    b0 = pl.program_id(0) * NB

    # Pass-through channels: native-width HBM read (BlockSpec DMA), VPU cast,
    # lane-dense store.  Fully overlapped with neighbouring grid steps by the
    # auto-pipeline.
    o_ref[:, :C] = x_ref[...].astype(jnp.float32)

    # Hoist the base loads out of the (static) batch loop.
    xxb = xxb_ref[...]
    yyb = yyb_ref[...]

    for i in range(NB):                          # static unroll
        # coord_pos[b] = (y_offset, x_offset); the torch code adds the x
        # offset to the row-varying channel (normalized by im_h-1) and the
        # y offset to the col-varying channel (normalized by im_w-1).
        cy = coord_ref[2 * (b0 + i)]
        cx = coord_ref[2 * (b0 + i) + 1]
        xx = xxb + cx * scale_h                  # (sub, TL)
        yy = yyb + cy * scale_w                  # (sub, TL)
        o_ref[i, C] = xx
        o_ref[i, C + 1] = yy
        if with_r:
            # sqrt goes to the EUP (separate issue slot) -> effectively free.
            o_ref[i, C + 2] = jnp.sqrt((xx - 0.5) ** 2 + (yy - 0.5) ** 2)


def add_coords(x, coord_pos, *, bb_h, bb_w, im_h, im_w, with_r=False):
    """Pallas implementation of AddCoords.forward for rank == 2.

    x:         (N, C, H, W) float (any float dtype; cast to f32 in-kernel)
    coord_pos: (N, 2) float, (y_offset, x_offset) per batch element
    returns:   (N, C + 2 + with_r, H, W) float32
    """
    if im_h <= 1 or im_w <= 1:
        raise ValueError("im_h and im_w must be > 1 (normalization divides by im-1)")
    N, C, H, W = x.shape
    HW = H * W
    n_coord = 3 if with_r else 2
    c_out = C + n_coord

    # ---- layout choices -------------------------------------------------
    # Fold H*W into (sub, L): sublane-dense when possible, lane dim a
    # multiple of 128.  HBM linear order is unchanged by this refold.
    sub = 1
    for s in (8, 4, 2):
        if HW % (s * 128) == 0:
            sub = s
            break
    L = HW // sub

    # Spatial tile of the lane dim: keeps resident VMEM bounded for very
    # large H*W (v7x's 64 MiB VMEM / 32 MiB default scoped limit).
    TL = L
    if L > 2048:
        for cand in (2048, 1024, 512, 256, 128):
            if L % cand == 0:
                TL = cand
                break
    n_sp = L // TL

    # Fold several batch elements into one grid step when the per-batch
    # payload is tiny, to amortize the ~0.35us per-step overhead.
    NB = 1
    if n_sp == 1:
        per_batch_bytes = (C * np.dtype(x.dtype).itemsize + c_out * 4) * HW
        max_nb = min(N, 8, max(1, (2 << 20) // max(per_batch_bytes, 1)))
        for cand in range(max_nb, 0, -1):
            if N % cand == 0:
                NB = cand
                break

    # ---- trace-time constants -------------------------------------------
    # Nearest-neighbor resize (bb_h, bb_w) -> (H, W)  (src = floor(dst*in/out))
    # fused with the /(im-1)*2-1 normalization, flattened row-major and
    # refolded to the (sub, L) layout.
    si = (np.arange(H) * bb_h) // H                      # source row per out row
    sj = (np.arange(W) * bb_w) // W                      # source col per out col
    scale_h = 2.0 / float(im_h - 1)
    scale_w = 2.0 / float(im_w - 1)
    xx_base = np.repeat(si.astype(np.float32) * scale_h - 1.0, W).reshape(sub, L)
    yy_base = np.tile(sj.astype(np.float32) * scale_w - 1.0, H).reshape(sub, L)

    x_r = x.reshape(N, C, sub, L)                        # native dtype, no pre-cast
    coord_flat = coord_pos.astype(jnp.float32).reshape(-1)   # (2N,) 1-D for SMEM

    kernel = functools.partial(
        _addcoords_kernel, C=C, NB=NB,
        scale_h=scale_h, scale_w=scale_w, with_r=with_r)

    out = pl.pallas_call(
        kernel,
        out_shape=jax.ShapeDtypeStruct((N, c_out, sub, L), jnp.float32),
        grid=(N // NB, n_sp),
        in_specs=[
            # coord_pos: read only as per-batch scalars -> SMEM, untiled.
            pl.BlockSpec(memory_space=pltpu.MemorySpace.SMEM),
            pl.BlockSpec((sub, TL), lambda b, j: (0, j)),        # xx_base
            pl.BlockSpec((sub, TL), lambda b, j: (0, j)),        # yy_base
            pl.BlockSpec((NB, C, sub, TL), lambda b, j: (b, 0, 0, j)),
        ],
        out_specs=pl.BlockSpec((NB, c_out, sub, TL), lambda b, j: (b, 0, 0, j)),
        compiler_params=pltpu.CompilerParams(
            dimension_semantics=("parallel", "parallel")),
    )(coord_flat, jnp.asarray(xx_base), jnp.asarray(yy_base), x_r)

    return out.reshape(N, c_out, H, W)


def _reference(x, coord_pos, *, bb_h, bb_w, im_h, im_w, with_r):
    """Pure numpy port of the PyTorch rank==2 branch (incl. nearest interp)."""
    x = np.asarray(x, np.float32)
    coord_pos = np.asarray(coord_pos, np.float32)
    N, C, H, W = x.shape
    si = (np.arange(H) * bb_h) // H
    sj = (np.arange(W) * bb_w) // W
    outs = []
    for b in range(N):
        base_i = np.arange(bb_h, dtype=np.float32)[:, None] * np.ones((1, bb_w), np.float32)
        base_j = np.arange(bb_w, dtype=np.float32)[None, :] * np.ones((bb_h, 1), np.float32)
        xx = (base_i + coord_pos[b, 1]) / float(im_h - 1) * 2.0 - 1.0
        yy = (base_j + coord_pos[b, 0]) / float(im_w - 1) * 2.0 - 1.0
        xx = xx[si][:, sj]
        yy = yy[si][:, sj]
        chans = [x[b], xx[None], yy[None]]
        if with_r:
            chans.append(np.sqrt((xx - 0.5) ** 2 + (yy - 0.5) ** 2)[None])
        outs.append(np.concatenate(chans, axis=0))
    return np.stack(outs, axis=0)


if __name__ == "__main__":
    # Small deterministic config consistent with the module's forward.
    N, C, H, W = 2, 4, 16, 16
    bb_h, bb_w = 8, 8        # bounding-box grid size (pre-interpolation)
    im_h, im_w = 32, 32      # normalization extents
    with_r = True

    key = jax.random.PRNGKey(0)
    kx, kc = jax.random.split(key)
    x = jax.random.normal(kx, (N, C, H, W), dtype=jnp.float32)
    coord_pos = jax.random.uniform(kc, (N, 2), dtype=jnp.float32,
                                   minval=0.0, maxval=8.0)

    out = add_coords(x, coord_pos, bb_h=bb_h, bb_w=bb_w,
                     im_h=im_h, im_w=im_w, with_r=with_r)
    out = jax.block_until_ready(out)

    ref = _reference(np.asarray(x), np.asarray(coord_pos),
                     bb_h=bb_h, bb_w=bb_w, im_h=im_h, im_w=im_w, with_r=with_r)

    assert out.shape == (N, C + 3, H, W), out.shape
    np.testing.assert_allclose(np.asarray(out), ref, rtol=1e-6, atol=1e-6)
    print("KERNEL_OK")
</pallas_src>

<mosaic_0001>
module attributes {stable_mosaic.version = 11 : i64} {
  func.func @_addcoords_kernel(%arg0: i32, %arg1: i32, %arg2: memref<4xf32, #tpu.memory_space<smem>>, %arg3: memref<2x128xf32, #tpu.memory_space<vmem>>, %arg4: memref<2x128xf32, #tpu.memory_space<vmem>>, %arg5: memref<2x4x2x128xf32, #tpu.memory_space<vmem>>, %arg6: memref<2x7x2x128xf32, #tpu.memory_space<vmem>>) attributes {dimension_semantics = [#tpu.dimension_semantics<parallel>, #tpu.dimension_semantics<parallel>], iteration_bounds = array<i64: 1, 1>, scalar_prefetch = 0 : i64, scratch_operands = 0 : i64, tpu.core_type = #tpu.core_type<tc>, window_params = [{transform_indices = @transform_0, window_bounds = array<i64: 4>}, {transform_indices = @transform_1, window_bounds = array<i64: 2, 128>}, {transform_indices = @transform_2, window_bounds = array<i64: 2, 128>}, {transform_indices = @transform_3, window_bounds = array<i64: 2, 4, 2, 128>}, {transform_indices = @transform_4, window_bounds = array<i64: 2, 7, 2, 128>}]} {
    %c2_i32 = arith.constant 2 : i32
    %0 = arith.muli %arg0, %c2_i32 : i32
    %c0 = arith.constant 0 : index
    %c0_0 = arith.constant 0 : index
    %c0_1 = arith.constant 0 : index
    %c0_2 = arith.constant 0 : index
    %1 = vector.load %arg5[%c0, %c0_0, %c0_1, %c0_2] : memref<2x4x2x128xf32, #tpu.memory_space<vmem>>, vector<2x4x2x128xf32>
    %c0_3 = arith.constant 0 : index
    %c0_4 = arith.constant 0 : index
    %c0_5 = arith.constant 0 : index
    %c0_6 = arith.constant 0 : index
    %2 = vector.load %arg6[%c0_3, %c0_4, %c0_5, %c0_6] : memref<2x7x2x128xf32, #tpu.memory_space<vmem>>, vector<2x4x2x128xf32>
    tpu.vector_store %arg6[%c0_3, %c0_4, %c0_5, %c0_6], %1 {strides = array<i32>} : memref<2x7x2x128xf32, #tpu.memory_space<vmem>>, vector<2x4x2x128xf32>,
    %c0_7 = arith.constant 0 : index
    %c0_8 = arith.constant 0 : index
    %3 = vector.load %arg3[%c0_7, %c0_8] : memref<2x128xf32, #tpu.memory_space<vmem>>, vector<2x128xf32>
    %c0_9 = arith.constant 0 : index
    %c0_10 = arith.constant 0 : index
    %4 = vector.load %arg4[%c0_9, %c0_10] : memref<2x128xf32, #tpu.memory_space<vmem>>, vector<2x128xf32>
    %c0_i32 = arith.constant 0 : i32
    %5 = arith.addi %0, %c0_i32 : i32
    %c2_i32_11 = arith.constant 2 : i32
    %6 = arith.muli %c2_i32_11, %5 : i32
    %7 = arith.index_cast %6 : i32 to index
    %8 = memref.load %arg2[%7] : memref<4xf32, #tpu.memory_space<smem>>
    %c0_i32_12 = arith.constant 0 : i32
    %9 = arith.addi %0, %c0_i32_12 : i32
    %c2_i32_13 = arith.constant 2 : i32
    %10 = arith.muli %c2_i32_13, %9 : i32
    %c1_i32 = arith.constant 1 : i32
    %11 = arith.addi %10, %c1_i32 : i32
    %12 = arith.index_cast %11 : i32 to index
    %13 = memref.load %arg2[%12] : memref<4xf32, #tpu.memory_space<smem>>
    %cst = arith.constant 0.0645161271 : f32
    %14 = arith.mulf %13, %cst : f32
    %15 = vector.broadcast %14 : f32 to vector<2x128xf32>
    %16 = arith.addf %3, %15 : vector<2x128xf32>
    %cst_14 = arith.constant 0.0645161271 : f32
    %17 = arith.mulf %8, %cst_14 : f32
    %18 = vector.broadcast %17 : f32 to vector<2x128xf32>
    %19 = arith.addf %4, %18 : vector<2x128xf32>
    %c0_15 = arith.constant 0 : index
    %c4 = arith.constant 4 : index
    %c0_16 = arith.constant 0 : index
    %c0_17 = arith.constant 0 : index
    %20 = vector.load %arg6[%c0_15, %c4, %c0_16, %c0_17] : memref<2x7x2x128xf32, #tpu.memory_space<vmem>>, vector<1x1x2x128xf32>
    %21 = vector.shape_cast %20 : vector<1x1x2x128xf32> to vector<2x128xf32>
    %22 = vector.shape_cast %16 : vector<2x128xf32> to vector<1x1x2x128xf32>
    tpu.vector_store %arg6[%c0_15, %c4, %c0_16, %c0_17], %22 {strides = array<i32>} : memref<2x7x2x128xf32, #tpu.memory_space<vmem>>, vector<1x1x2x128xf32>,
    %c0_18 = arith.constant 0 : index
    %c5 = arith.constant 5 : index
    %c0_19 = arith.constant 0 : index
    %c0_20 = arith.constant 0 : index
    %23 = vector.load %arg6[%c0_18, %c5, %c0_19, %c0_20] : memref<2x7x2x128xf32, #tpu.memory_space<vmem>>, vector<1x1x2x128xf32>
    %24 = vector.shape_cast %23 : vector<1x1x2x128xf32> to vector<2x128xf32>
    %25 = vector.shape_cast %19 : vector<2x128xf32> to vector<1x1x2x128xf32>
    tpu.vector_store %arg6[%c0_18, %c5, %c0_19, %c0_20], %25 {strides = array<i32>} : memref<2x7x2x128xf32, #tpu.memory_space<vmem>>, vector<1x1x2x128xf32>,
    %cst_21 = arith.constant 5.000000e-01 : f32
    %26 = vector.broadcast %cst_21 : f32 to vector<2x128xf32>
    %27 = arith.subf %16, %26 : vector<2x128xf32>
    %28 = arith.mulf %27, %27 : vector<2x128xf32>
    %cst_22 = arith.constant 5.000000e-01 : f32
    %29 = vector.broadcast %cst_22 : f32 to vector<2x128xf32>
    %30 = arith.subf %19, %29 : vector<2x128xf32>
    %31 = arith.mulf %30, %30 : vector<2x128xf32>
    %32 = arith.addf %28, %31 : vector<2x128xf32>
    %33 = math.sqrt %32 : vector<2x128xf32>
    %c0_23 = arith.constant 0 : index
    %c6 = arith.constant 6 : index
    %c0_24 = arith.constant 0 : index
    %c0_25 = arith.constant 0 : index
    %34 = vector.load %arg6[%c0_23, %c6, %c0_24, %c0_25] : memref<2x7x2x128xf32, #tpu.memory_space<vmem>>, vector<1x1x2x128xf32>
    %35 = vector.shape_cast %34 : vector<1x1x2x128xf32> to vector<2x128xf32>
    %36 = vector.shape_cast %33 : vector<2x128xf32> to vector<1x1x2x128xf32>
    tpu.vector_store %arg6[%c0_23, %c6, %c0_24, %c0_25], %36 {strides = array<i32>} : memref<2x7x2x128xf32, #tpu.memory_space<vmem>>, vector<1x1x2x128xf32>,
    %c1_i32_26 = arith.constant 1 : i32
    %37 = arith.addi %0, %c1_i32_26 : i32
    %c2_i32_27 = arith.constant 2 : i32
    %38 = arith.muli %c2_i32_27, %37 : i32
    %39 = arith.index_cast %38 : i32 to index
    %40 = memref.load %arg2[%39] : memref<4xf32, #tpu.memory_space<smem>>
    %c1_i32_28 = arith.constant 1 : i32
    %41 = arith.addi %0, %c1_i32_28 : i32
    %c2_i32_29 = arith.constant 2 : i32
    %42 = arith.muli %c2_i32_29, %41 : i32
    %c1_i32_30 = arith.constant 1 : i32
    %43 = arith.addi %42, %c1_i32_30 : i32
    %44 = arith.index_cast %43 : i32 to index
    %45 = memref.load %arg2[%44] : memref<4xf32, #tpu.memory_space<smem>>
    %cst_31 = arith.constant 0.0645161271 : f32
    %46 = arith.mulf %45, %cst_31 : f32
    %47 = vector.broadcast %46 : f32 to vector<2x128xf32>
    %48 = arith.addf %3, %47 : vector<2x128xf32>
    %cst_32 = arith.constant 0.0645161271 : f32
    %49 = arith.mulf %40, %cst_32 : f32
    %50 = vector.broadcast %49 : f32 to vector<2x128xf32>
    %51 = arith.addf %4, %50 : vector<2x128xf32>
    %c1 = arith.constant 1 : index
    %c4_33 = arith.constant 4 : index
    %c0_34 = arith.constant 0 : index
    %c0_35 = arith.constant 0 : index
    %52 = vector.load %arg6[%c1, %c4_33, %c0_34, %c0_35] : memref<2x7x2x128xf32, #tpu.memory_space<vmem>>, vector<1x1x2x128xf32>
    %53 = vector.shape_cast %52 : vector<1x1x2x128xf32> to vector<2x128xf32>
    %54 = vector.shape_cast %48 : vector<2x128xf32> to vector<1x1x2x128xf32>
    tpu.vector_store %arg6[%c1, %c4_33, %c0_34, %c0_35], %54 {strides = array<i32>} : memref<2x7x2x128xf32, #tpu.memory_space<vmem>>, vector<1x1x2x128xf32>,
    %c1_36 = arith.constant 1 : index
    %c5_37 = arith.constant 5 : index
    %c0_38 = arith.constant 0 : index
    %c0_39 = arith.constant 0 : index
    %55 = vector.load %arg6[%c1_36, %c5_37, %c0_38, %c0_39] : memref<2x7x2x128xf32, #tpu.memory_space<vmem>>, vector<1x1x2x128xf32>
    %56 = vector.shape_cast %55 : vector<1x1x2x128xf32> to vector<2x128xf32>
    %57 = vector.shape_cast %51 : vector<2x128xf32> to vector<1x1x2x128xf32>
    tpu.vector_store %arg6[%c1_36, %c5_37, %c0_38, %c0_39], %57 {strides = array<i32>} : memref<2x7x2x128xf32, #tpu.memory_space<vmem>>, vector<1x1x2x128xf32>,
    %cst_40 = arith.constant 5.000000e-01 : f32
    %58 = vector.broadcast %cst_40 : f32 to vector<2x128xf32>
    %59 = arith.subf %48, %58 : vector<2x128xf32>
    %60 = arith.mulf %59, %59 : vector<2x128xf32>
    %cst_41 = arith.constant 5.000000e-01 : f32
    %61 = vector.broadcast %cst_41 : f32 to vector<2x128xf32>
    %62 = arith.subf %51, %61 : vector<2x128xf32>
    %63 = arith.mulf %62, %62 : vector<2x128xf32>
    %64 = arith.addf %60, %63 : vector<2x128xf32>
    %65 = math.sqrt %64 : vector<2x128xf32>
    %c1_42 = arith.constant 1 : index
    %c6_43 = arith.constant 6 : index
    %c0_44 = arith.constant 0 : index
    %c0_45 = arith.constant 0 : index
    %66 = vector.load %arg6[%c1_42, %c6_43, %c0_44, %c0_45] : memref<2x7x2x128xf32, #tpu.memory_space<vmem>>, vector<1x1x2x128xf32>
    %67 = vector.shape_cast %66 : vector<1x1x2x128xf32> to vector<2x128xf32>
    %68 = vector.shape_cast %65 : vector<2x128xf32> to vector<1x1x2x128xf32>
    tpu.vector_store %arg6[%c1_42, %c6_43, %c0_44, %c0_45], %68 {strides = array<i32>} : memref<2x7x2x128xf32, #tpu.memory_space<vmem>>, vector<1x1x2x128xf32>,
    return
  }
  func.func @transform_0(%arg0: i32, %arg1: i32) -> i32 {
    %c0_i32 = arith.constant 0 : i32
    %c0_i32_0 = arith.constant 0 : i32
    return %c0_i32 : i32
  }
  func.func @transform_1(%arg0: i32, %arg1: i32) -> (i32, i32) {
    %c0_i32 = arith.constant 0 : i32
    %c0_i32_0 = arith.constant 0 : i32
    return %c0_i32, %arg1 : i32, i32
  }
  func.func @transform_2(%arg0: i32, %arg1: i32) -> (i32, i32) {
    %c0_i32 = arith.constant 0 : i32
    %c0_i32_0 = arith.constant 0 : i32
    return %c0_i32, %arg1 : i32, i32
  }
  func.func @transform_3(%arg0: i32, %arg1: i32) -> (i32, i32, i32, i32) {
    %c0_i32 = arith.constant 0 : i32
    %c0_i32_0 = arith.constant 0 : i32
    %c0_i32_1 = arith.constant 0 : i32
    return %arg0, %c0_i32, %c0_i32_0, %arg1 : i32, i32, i32, i32
  }
  func.func @transform_4(%arg0: i32, %arg1: i32) -> (i32, i32, i32, i32) {
    %c0_i32 = arith.constant 0 : i32
    %c0_i32_0 = arith.constant 0 : i32
    %c0_i32_1 = arith.constant 0 : i32
    return %arg0, %c0_i32, %c0_i32_0, %arg1 : i32, i32, i32, i32
  }
}

</mosaic_0001>

<bundles_post_ra>
// kernel: tpu_custom_call.1
= control target key start
LH: loop header
LB: loop body
LE: loop exit
PB: predicated region body
PF: predicated region fallthrough
CT: control target
= control target key end

     0   :  { %9 = vsyncpa [#allocation5], 0  ;;  %s291_s0 = inlined_call_operand.hbm [shape: f32[4], index: 0, kind: input, shape index: {}]   ;;  %s292_s1 = inlined_call_operand.vmem [shape: f32[2,128], index: 1, kind: input, shape index: {}]   ;;  %s293_s2 = inlined_call_operand.vmem [shape: f32[2,128], index: 2, kind: input, shape index: {}]   ;;  %s294_s3 = inlined_call_operand.hbm [shape: f32[2,4,2,128], index: 3, kind: input, shape index: {}]   ;;  %s295_s4 = inlined_call_operand.hbm [shape: f32[2,7,2,128], index: 4, kind: output, shape index: {}]  }
   0x1   :  { %10 = vsyncpa [#allocation3], 0 }
   0x2   :  { %11 = vsyncpa [#allocation4], 0  ;;  %s153_s17 = scalar_lea.hbm %s291_s0, 16 }
   0x3   :  { %p154_p0 = scmp.ne.s32.totalorder %s291_s0, %s153_s17  ;;  %p157_p1 = scmp.lt.u32.totalorder %s153_s17, %s291_s0 }
   0x5   :  { %p159_p2 = pnand %p157_p1, %p154_p0 }
   0x7   :  { %162 = shalt.err (!%p159_p2)
}
   0x8   :  { %s213_s22 = smov [#allocation2]   ;;  %s214_s25 = smov [#allocation6]  }
   0x9   :  { %19 = dma.hbm_to_smem %s291_s0, 16, %s213_s22, [#allocation5]  }
   0xa   :  { %s29_s26 = sshll.u32 %s214_s25, 4  ;;  %s163_s29 = scalar_lea.hbm %s294_s3, 256  ;;  %s30_s26 = int_to_ptr.vmem [resolvable:$true] %s29_s26 }
   0xb   :  { %p164_p3 = scmp.ne.s32.totalorder %s294_s3, %s163_s29  ;;  %p167_p4 = scmp.lt.u32.totalorder %s163_s29, %s294_s3 }
   0xd   :  { %p169_p5 = pnand %p167_p4, %p164_p3 }
   0xf   :  { %172 = shalt.err (!%p169_p5)
}
  0x10   :  { %s173_s8 = scalar_lea.vmem %s30_s26, 256  ;;  %p178_p7 = scmp.lt.s32.totalorder %s30_s26, %s30_s26 }
  0x11   :  { %p174_p6 = scmp.ne.s32.totalorder %s30_s26, %s173_s8  ;;  %p179_p8 = scmp.lt.s32.totalorder %s173_s8, %s173_s8 }
  0x13   :  { %p180_p9 = por %p179_p8, %p178_p7 }
  0x15   :  { %p181_p10 = pnand %p180_p9, %p174_p6 }
  0x17   :  { %184 = shalt.err (!%p181_p10)
}
  0x18   :  { %s215_s0 = smov 32   ;;  %s216_s9 = smov 2  }
  0x19   :  { %35 = dma.hbm_to_vmem [thread:$0]  %s294_s3, 256, %s30_s26, [#allocation3], %s215_s0, %s215_s0, %s216_s9  }
  0x1a   :  { %207 = dma.done.wait [#allocation5], 16  }
  0x1b   :  { %208 = vsyncadd [#allocation5], 4294967280 }
  0x1c   :  { %209 = dma.done.wait [#allocation3], 256  }
  0x1d   :  { %210 = vsyncadd [#allocation3], 4294967040 }
  0x1e   :  { %42 = sfence }
  0x1f   :  { %v44_v0 = vld [vmem:[#allocation6] sm:$0xff]   ;;  %v48_v1 = vld [vmem:[#allocation6 + $0x8] sm:$0xff]   ;;  %s137_s12 = sld [smem:[#allocation2 + $0x1]]  ;;  %s63_s13 = sld [smem:[#allocation2]]  ;;  %v60_v2 = vld [vmem:[%s292_s1] sm:$0x3] }
  0x20   :  { %52 = vst [vmem:[#allocation7] sm:$0xff] %v44_v0   ;;  %56 = vst [vmem:[#allocation7 + $0xe] sm:$0xff] %v48_v1   ;;  %s141_s14 = sld [smem:[#allocation2 + $0x3]]  ;;  %s140_s15 = sld [smem:[#allocation2 + $0x2]]  ;;  %v61_v3 = vld [vmem:[%s293_s2] sm:$0x3] }
  0x21   :  { %s217_s1 = smov [#allocation7]  }
  0x22   :  { %s124_s2 = sshll.u32 %s217_s1, 4  ;;  %s125_s2 = int_to_ptr.vmem [resolvable:$true] %s124_s2 }
  0x23   :  { %s185_s23 = scalar_lea.vmem %s125_s2, 448  ;;  %p190_p12 = scmp.lt.s32.totalorder %s125_s2, %s125_s2 }
  0x24   :  { %p186_p11 = scmp.ne.s32.totalorder %s125_s2, %s185_s23  ;;  %p191_p13 = scmp.lt.s32.totalorder %s185_s23, %s185_s23 }
  0x25   :  { %s66_s18 = smul.f32 0.06451613, %s137_s12 }
  0x26   :  { %s69_s20 = smul.f32 0.06451613, %s63_s13  ;;  %p192_p0 = por %p191_p13, %p190_p12 }
  0x27   :  { %v67_v4 = vstv %s66_s18  ;;  %s95_s21 = smul.f32 0.06451613, %s141_s14 }
  0x28   :  { %v68_v5 = vadd.f32 %v67_v4, %v60_v2  ;;  %v70_v6 = vstv %s69_s20  ;;  %s98_s22 = smul.f32 0.06451613, %s140_s15  ;;  %p193_p1 = pnand %p192_p0, %p186_p11 }
  0x29   :  { %v71_v7 = vadd.f32 %v70_v6, %v61_v3  ;;  %v96_v8 = vstv %s95_s21 }
  0x2a   :  { %73 = vst [vmem:[#allocation7 + $0x8] sm:$0x3] %v68_v5  ;;  %v138_v9 = vadd.f32 -0.5, %v68_v5  ;;  %v97_v10 = vadd.f32 %v96_v8, %v60_v2  ;;  %v99_v11 = vstv %s98_s22 }
  0x2b   :  { %75 = vst [vmem:[#allocation7 + $0xa] sm:$0x3] %v71_v7  ;;  %v139_v12 = vadd.f32 -0.5, %v71_v7  ;;  %v100_v13 = vadd.f32 %v99_v11, %v61_v3 }
  0x2c   :  { %v77_v14 = vmul.f32 %v138_v9, %v138_v9  ;;  %102 = vst [vmem:[#allocation7 + $0x16] sm:$0x3] %v97_v10  ;;  %v142_v15 = vadd.f32 -0.5, %v97_v10 }
  0x2d   :  { %v79_v16 = vmul.f32 %v139_v12, %v139_v12  ;;  %104 = vst [vmem:[#allocation7 + $0x18] sm:$0x3] %v100_v13  ;;  %v143_v17 = vadd.f32 -0.5, %v100_v13 }
  0x2e   :  { %v106_v18 = vmul.f32 %v142_v15, %v142_v15 }
  0x2f   :  { %v80_v19 = vadd.f32 %v79_v16, %v77_v14  ;;  %v108_v20 = vmul.f32 %v143_v17, %v143_v17 }
  0x31   :  { %149 = vrsqrt.f32 %v80_v19  ;;  %v109_v21 = vadd.f32 %v108_v20, %v106_v18  ;;  %vm83_vm0 = vcmp.eq.f32.partialorder %v80_v19, inf  ;;  %v86_v23 = vand.u32 2147483648, %v80_v19 }
  0x32   :  { %vm85_vm1 = vcmp.eq.f32.partialorder %v80_v19, 0.0 }
  0x33   :  { %151 = vrsqrt.f32 %v109_v21  ;;  %vm112_vm2 = vcmp.eq.f32.partialorder %v109_v21, inf  ;;  %v115_v27 = vand.u32 2147483648, %v109_v21  ;;  %vm114_vm3 = vcmp.eq.f32.partialorder %v109_v21, 0.0 }
  0x3b   :  { %v150_v22 = vpop.eup %149 }
  0x3c   :  { %v82_v24 = vmul.f32 %v150_v22, %v80_v19 }
  0x3d   :  { %v152_v25 = vpop.eup %151 }
  0x3e   :  { %v84_v26 = vsel %vm83_vm0, %v80_v19, %v82_v24  ;;  %v111_v29 = vmul.f32 %v152_v25, %v109_v21 }
  0x3f   :  { %v87_v28 = vsel %vm85_vm1, %v86_v23, %v84_v26 }
  0x40   :  { %89 = vst [vmem:[#allocation7 + $0xc] sm:$0x3] %v87_v28  ;;  %v113_v30 = vsel %vm112_vm2, %v109_v21, %v111_v29 }
  0x41   :  { %v116_v31 = vsel %vm114_vm3, %v115_v27, %v113_v30 }
  0x42   :  { %118 = vst [vmem:[#allocation7 + $0x1a] sm:$0x3] %v116_v31 }
  0x43   :  { %196 = shalt.err (!%p193_p1)
}
  0x44   :  { %s197_s26 = scalar_lea.hbm %s295_s4, 448 }
  0x45   :  { %p198_p2 = scmp.ne.s32.totalorder %s295_s4, %s197_s26  ;;  %p201_p3 = scmp.lt.u32.totalorder %s197_s26, %s295_s4 }
  0x47   :  { %p203_p4 = pnand %p201_p3, %p198_p2 }
  0x49   :  { %206 = shalt.err (!%p203_p4)
}
  0x4a   :  { %130 = dma.vmem_to_hbm [thread:$0]  %s125_s2, 448, %s295_s4, [#allocation4], %s215_s0, %s215_s0, %s216_s9  }
  0x4b   :  { %211 = dma.done.wait [#allocation4], 448  }
  0x4c   :  { %212 = vsyncadd [#allocation4], 4294966848 }
  0x4d   :  { %134 = vsyncpa [#allocation3], 1 }
  0x4e   :  { %135 = vsyncpa [#allocation4], 1 }
  0x4f   :  { %136 = vsyncpa [#allocation5], 1 }

</bundles_post_ra>
